<compile_context>
chip_gen: v6e
topology: v6e:2x2x1
jax: 0.10.0
libtpu: 0.0.40
codegen_flags: <defaults>
</compile_context>

<pallas_src>
import functools

import jax
import jax.numpy as jnp
import numpy as np
from jax.experimental import pallas as pl
from jax.experimental.pallas import tpu as pltpu


def _attn_filtration_kernel(x_ref, w_ref, b_ref, o_ref, *, eps):
    # x_ref: (TB, L, D) sim_emb tile (VMEM)
    # w_ref: (1, D)     BN-folded attention weight (resident VMEM)
    # b_ref: (1, 1)     BN-folded scalar shift (SMEM)
    # o_ref: (TB, D)
    x = x_ref[...].astype(jnp.float32)            # (TB, L, D)
    w = w_ref[...].astype(jnp.float32)            # (1, D) -> broadcasts over (L, D)
    shift = b_ref[0, 0]                           # scalar

    # Gate score per (batch, alignment): Linear(D -> 1) with BN folded in.
    scores = jnp.sum(x * w, axis=-1, keepdims=True) + shift      # (TB, L, 1)

    # Sigmoid gate (manual formula keeps Mosaic lowering simple) + L1-norm over L.
    gate = 1.0 / (1.0 + jnp.exp(-scores))                        # (TB, L, 1), > 0
    attn = gate / (jnp.sum(gate, axis=1, keepdims=True) + eps)   # (TB, L, 1)

    # Weighted aggregation over the L alignments: (TB, L, 1)*(TB, L, D) -> (TB, D).
    agg = jnp.sum(attn * x, axis=1)                              # (TB, D)

    # L2-normalize along the sim_dim axis (eps added after sqrt, as in l2norm).
    norm = jnp.sqrt(jnp.sum(agg * agg, axis=-1, keepdims=True)) + eps
    o_ref[...] = (agg / norm).astype(o_ref.dtype)


def attention_filtration_forward(sim_emb, attn_w, attn_b,
                                 bn_gamma, bn_beta, bn_mean, bn_var,
                                 *, bn_eps=1e-5, eps=1e-8, block_b=128):
    """AttentionFiltration forward.

    sim_emb: (B, L, D);  attn_w: (1, D) [PyTorch Linear(D, 1) weight];  attn_b: (1,)
    bn_*:    (1,) BatchNorm1d(1) affine params / running stats (inference mode).
    Returns (B, D).
    """
    B, L, D = sim_emb.shape

    # Fold Linear bias + BatchNorm1d (running stats) into the weight vector and a
    # scalar shift:  bn(x.w + b) = x.(w*s) + ((b - mean)*s + beta),  s = gamma/sqrt(var+eps)
    s = (bn_gamma.astype(jnp.float32) /
         jnp.sqrt(bn_var.astype(jnp.float32) + bn_eps))                      # (1,)
    w_eff = attn_w.reshape(1, D).astype(jnp.float32) * s.reshape(1, 1)       # (1, D)
    b_eff = ((attn_b.astype(jnp.float32) - bn_mean.astype(jnp.float32)) * s
             + bn_beta.astype(jnp.float32)).reshape(1, 1)                    # (1, 1)

    # Batch tile: full B if small, otherwise a multiple of 8 (sublane-aligned).
    tb = B if B <= block_b else block_b
    grid = (pl.cdiv(B, tb),)

    kernel = functools.partial(_attn_filtration_kernel, eps=eps)

    itemsize = jnp.dtype(sim_emb.dtype).itemsize
    cost = pl.CostEstimate(
        flops=4 * B * L * D,                 # score dot + weighted aggregation
        transcendentals=B * L + B,           # sigmoid exp per score + sqrt per row
        bytes_accessed=B * L * D * itemsize + D * 4 + B * D * itemsize,
    )

    out = pl.pallas_call(
        kernel,
        out_shape=jax.ShapeDtypeStruct((B, D), sim_emb.dtype),
        grid=grid,
        in_specs=[
            pl.BlockSpec((tb, L, D), lambda i: (i, 0, 0)),        # sim_emb tile
            pl.BlockSpec((1, D), lambda i: (0, 0)),               # resident folded weight
            pl.BlockSpec(memory_space=pltpu.MemorySpace.SMEM),    # scalar shift
        ],
        out_specs=pl.BlockSpec((tb, D), lambda i: (i, 0)),
        compiler_params=pltpu.CompilerParams(
            dimension_semantics=("parallel",)),
        cost_estimate=cost,
    )(sim_emb, w_eff, b_eff)
    return out


def init_attention_filtration_params(key, sim_dim, dtype=jnp.float32):
    """Matches PyTorch init_weights: Xavier-uniform Linear weight, zero bias,
    BatchNorm1d gamma=1, beta=0 (plus default running stats mean=0, var=1)."""
    r = np.sqrt(6.0) / np.sqrt(sim_dim + 1)
    attn_w = jax.random.uniform(key, (1, sim_dim), dtype=dtype, minval=-r, maxval=r)
    attn_b = jnp.zeros((1,), dtype=dtype)
    bn_gamma = jnp.ones((1,), dtype=dtype)
    bn_beta = jnp.zeros((1,), dtype=dtype)
    bn_mean = jnp.zeros((1,), dtype=dtype)
    bn_var = jnp.ones((1,), dtype=dtype)
    return attn_w, attn_b, bn_gamma, bn_beta, bn_mean, bn_var


def _reference_forward(sim_emb, attn_w, attn_b, bn_gamma, bn_beta, bn_mean, bn_var,
                       bn_eps=1e-5, eps=1e-8):
    """Pure-JAX reference mirroring the PyTorch forward (BN in inference mode)."""
    scores = jnp.einsum("bld,od->bol", sim_emb, attn_w) + attn_b[None, :, None]  # (B,1,L)
    y = (scores - bn_mean[None, :, None]) / jnp.sqrt(bn_var[None, :, None] + bn_eps)
    y = y * bn_gamma[None, :, None] + bn_beta[None, :, None]
    a = 1.0 / (1.0 + jnp.exp(-y))                                                # (B,1,L)
    a = a / (jnp.sum(jnp.abs(a), axis=-1, keepdims=True) + eps)                  # l1norm
    agg = jnp.matmul(a, sim_emb)[:, 0, :]                                        # (B, D)
    norm = jnp.sqrt(jnp.sum(agg * agg, axis=-1, keepdims=True)) + eps            # l2norm
    return agg / norm


if __name__ == "__main__":
    # Small shapes consistent with (batch, L+1 alignments, sim_dim=256) -> (batch, sim_dim)
    batch, n_align, sim_dim = 16, 9, 256

    key = jax.random.PRNGKey(0)
    k_x, k_w, k_m, k_v, k_g = jax.random.split(key, 5)

    sim_emb = jax.random.normal(k_x, (batch, n_align, sim_dim), dtype=jnp.float32)
    attn_w, attn_b, bn_gamma, bn_beta, bn_mean, bn_var = \
        init_attention_filtration_params(k_w, sim_dim)

    # Perturb BN running stats / affine params so the folding path is actually exercised.
    bn_mean = 0.1 * jax.random.normal(k_m, (1,), dtype=jnp.float32)
    bn_var = jax.random.uniform(k_v, (1,), dtype=jnp.float32, minval=0.5, maxval=1.5)
    bn_gamma = 1.0 + 0.1 * jax.random.normal(k_g, (1,), dtype=jnp.float32)
    bn_beta = jnp.full((1,), 0.05, dtype=jnp.float32)

    out = attention_filtration_forward(
        sim_emb, attn_w, attn_b, bn_gamma, bn_beta, bn_mean, bn_var,
        block_b=8)  # tb=8 -> grid=(2,): exercises the batch tiling + parallel axis
    out = jax.block_until_ready(out)

    ref = _reference_forward(sim_emb, attn_w, attn_b, bn_gamma, bn_beta, bn_mean, bn_var)
    np.testing.assert_allclose(np.asarray(out), np.asarray(ref), rtol=1e-4, atol=1e-5)

    assert out.shape == (batch, sim_dim)
    print("KERNEL_OK")
</pallas_src>

<mosaic_0001>
module attributes {stable_mosaic.version = 11 : i64} {
  func.func @_attn_filtration_kernel(%arg0: i32, %arg1: memref<8x9x256xf32, #tpu.memory_space<vmem>>, %arg2: memref<1x256xf32, #tpu.memory_space<vmem>>, %arg3: memref<1x1xf32, #tpu.memory_space<smem>>, %arg4: memref<8x256xf32, #tpu.memory_space<vmem>>) attributes {dimension_semantics = [#tpu.dimension_semantics<parallel>], iteration_bounds = array<i64: 2>, scalar_prefetch = 0 : i64, scratch_operands = 0 : i64, tpu.core_type = #tpu.core_type<tc>, window_params = [{transform_indices = @transform_0, window_bounds = array<i64: 8, 9, 256>}, {pipeline_mode = #tpu.pipeline_mode<synchronous>, transform_indices = @transform_1, window_bounds = array<i64: 1, 256>}, {transform_indices = @transform_2, window_bounds = array<i64: 1, 1>}, {transform_indices = @transform_3, window_bounds = array<i64: 8, 256>}]} {
    %c0 = arith.constant 0 : index
    %c0_0 = arith.constant 0 : index
    %c0_1 = arith.constant 0 : index
    %0 = vector.load %arg1[%c0, %c0_0, %c0_1] : memref<8x9x256xf32, #tpu.memory_space<vmem>>, vector<8x9x256xf32>
    %c0_2 = arith.constant 0 : index
    %c0_3 = arith.constant 0 : index
    %1 = vector.load %arg2[%c0_2, %c0_3] : memref<1x256xf32, #tpu.memory_space<vmem>>, vector<1x256xf32>
    %c0_4 = arith.constant 0 : index
    %c0_5 = arith.constant 0 : index
    %2 = memref.load %arg3[%c0_4, %c0_5] : memref<1x1xf32, #tpu.memory_space<smem>>
    %3 = vector.shape_cast %1 : vector<1x256xf32> to vector<1x1x256xf32>
    %4 = vector.broadcast %3 : vector<1x1x256xf32> to vector<8x9x256xf32>
    %5 = arith.mulf %0, %4 : vector<8x9x256xf32>
    %cst = arith.constant dense<0.000000e+00> : vector<8x9xf32>
    %6 = vector.multi_reduction <add>, %5, %cst [2] : vector<8x9x256xf32> to vector<8x9xf32>
    %7 = vector.shape_cast %6 : vector<8x9xf32> to vector<8x9x1xf32>
    %8 = vector.broadcast %2 : f32 to vector<8x9x1xf32>
    %9 = arith.addf %7, %8 : vector<8x9x1xf32>
    %cst_6 = arith.constant 0.000000e+00 : f32
    %10 = vector.broadcast %cst_6 : f32 to vector<8x9x1xf32>
    %11 = arith.subf %10, %9 : vector<8x9x1xf32>
    %12 = math.exp %11 : vector<8x9x1xf32>
    %cst_7 = arith.constant 1.000000e+00 : f32
    %13 = vector.broadcast %cst_7 : f32 to vector<8x9x1xf32>
    %14 = arith.addf %13, %12 : vector<8x9x1xf32>
    %cst_8 = arith.constant 1.000000e+00 : f32
    %15 = vector.broadcast %cst_8 : f32 to vector<8x9x1xf32>
    %16 = arith.divf %15, %14 : vector<8x9x1xf32>
    %cst_9 = arith.constant dense<0.000000e+00> : vector<8x1xf32>
    %17 = vector.multi_reduction <add>, %16, %cst_9 [1] : vector<8x9x1xf32> to vector<8x1xf32>
    %18 = vector.shape_cast %17 : vector<8x1xf32> to vector<8x1x1xf32>
    %cst_10 = arith.constant 9.99999993E-9 : f32
    %19 = vector.broadcast %cst_10 : f32 to vector<8x1x1xf32>
    %20 = arith.addf %18, %19 : vector<8x1x1xf32>
    %21 = vector.broadcast %20 : vector<8x1x1xf32> to vector<8x9x1xf32>
    %22 = arith.divf %16, %21 : vector<8x9x1xf32>
    %23 = vector.broadcast %22 : vector<8x9x1xf32> to vector<8x9x256xf32>
    %24 = arith.mulf %23, %0 : vector<8x9x256xf32>
    %cst_11 = arith.constant dense<0.000000e+00> : vector<8x256xf32>
    %25 = vector.multi_reduction <add>, %24, %cst_11 [1] : vector<8x9x256xf32> to vector<8x256xf32>
    %26 = arith.mulf %25, %25 : vector<8x256xf32>
    %cst_12 = arith.constant dense<0.000000e+00> : vector<8xf32>
    %27 = vector.multi_reduction <add>, %26, %cst_12 [1] : vector<8x256xf32> to vector<8xf32>
    %28 = vector.shape_cast %27 : vector<8xf32> to vector<8x1xf32>
    %29 = math.sqrt %28 : vector<8x1xf32>
    %cst_13 = arith.constant 9.99999993E-9 : f32
    %30 = vector.broadcast %cst_13 : f32 to vector<8x1xf32>
    %31 = arith.addf %29, %30 : vector<8x1xf32>
    %32 = vector.broadcast %31 : vector<8x1xf32> to vector<8x256xf32>
    %33 = arith.divf %25, %32 : vector<8x256xf32>
    %c0_14 = arith.constant 0 : index
    %c0_15 = arith.constant 0 : index
    %34 = vector.load %arg4[%c0_14, %c0_15] : memref<8x256xf32, #tpu.memory_space<vmem>>, vector<8x256xf32>
    tpu.vector_store %arg4[%c0_14, %c0_15], %33 {strides = array<i32>} : memref<8x256xf32, #tpu.memory_space<vmem>>, vector<8x256xf32>,
    return
  }
  func.func @transform_0(%arg0: i32) -> (i32, i32, i32) {
    %c0_i32 = arith.constant 0 : i32
    %c0_i32_0 = arith.constant 0 : i32
    %c0_i32_1 = arith.constant 0 : i32
    return %arg0, %c0_i32, %c0_i32_0 : i32, i32, i32
  }
  func.func @transform_1(%arg0: i32) -> (i32, i32) {
    %c0_i32 = arith.constant 0 : i32
    %c0_i32_0 = arith.constant 0 : i32
    %c0_i32_1 = arith.constant 0 : i32
    return %c0_i32, %c0_i32_0 : i32, i32
  }
  func.func @transform_2(%arg0: i32) -> (i32, i32) {
    %c0_i32 = arith.constant 0 : i32
    %c0_i32_0 = arith.constant 0 : i32
    %c0_i32_1 = arith.constant 0 : i32
    return %c0_i32, %c0_i32_0 : i32, i32
  }
  func.func @transform_3(%arg0: i32) -> (i32, i32) {
    %c0_i32 = arith.constant 0 : i32
    %c0_i32_0 = arith.constant 0 : i32
    return %arg0, %c0_i32 : i32, i32
  }
}

</mosaic_0001>

<bundles_post_ra>
// kernel: tpu_custom_call.1
= control target key start
LH: loop header
LB: loop body
LE: loop exit
PB: predicated region body
PF: predicated region fallthrough
CT: control target
= control target key end

     0   :  { %s1686_s0 = inlined_call_operand.vmem [shape: f32[16,9,256], index: 0, kind: input, shape index: {}]   ;;  %s1687_s1 = inlined_call_operand.vmem [shape: f32[1,256], index: 1, kind: input, shape index: {}]   ;;  %s1688_s2 = inlined_call_operand.<no memory space> [shape: f32[1,1], index: 2, kind: input, shape index: {}]   ;;  %s1689_s3 = inlined_call_operand.hbm [shape: f32[16,256], index: 3, kind: output, shape index: {}]  }
   0x1   :  { %8 = sst [smem:[#allocation2]] %s1688_s2 }
   0x2   :  { %9 = vsyncpa [#allocation4], 0 }
   0x3   :  { %11 = vsyncpa [#allocation4 + $0x1], 0  ;;  %s1152_s14 = smov 0   ;;  %s1154_s15 = smov 0  }
   0x4   :  { %s1156_s16 = smov 0   ;;  %s1158_s17 = smov 0  }
   0x5 LB: > { %s1173_s2 = sadd.s32 4294967295, %s1126_s17   ;;  %s914_s18 = sadd.s32 4294967294, %s1126_s17   ;;  %s1126_s17 = sphi %s1158_s17, %s1713_s17   ;;  %s1122_s16 = sphi %s1156_s16, %s1712_s16   ;;  %s1118_s15 = sphi %s1154_s15, %s1711_s15   ;;  %s1114_s14 = sphi %s1152_s14, %s1710_s14  }
   0x6   : > { %s1177_s19 = sadd.s32 1, %s1126_s17   ;;  %s92_s20 = sadd.s32 1, %s1122_s16 }
   0x7   : > { %s89_s21 = ssub.s32 %s1126_s17, %s1177_s19  ;;  %p102_p0 = scmp.ne.s32.totalorder %s1122_s16, %s1118_s15 }
   0x8   : > { %p90_p1 = scmp.eq.s32.totalorder %s89_s21, 0  ;;  %p103_p2 = scmp.eq.s32.totalorder %s1173_s2, 1 }
   0x9   : > { %p108_p3 = scmp.ne.s32.totalorder %s1118_s15, %s1114_s14  ;;  %p109_p4 = scmp.eq.s32.totalorder %s914_s18, 1 }
   0xa   : > { %s1188_s22 = scalar_select %p90_p1, %s1122_s16, %s92_s20  }
   0xb   : > { %p1190_p5 = por %p103_p2, %p102_p0  ;;  %p1194_p6 = por %p109_p4, %p108_p3 }
   0xc   : > { %p917_p7 = scmp.ge.s32.totalorder %s1126_s17, 1  ;;  %p143_p8 = scmp.lt.s32.totalorder %s1126_s17, 3 }
   0xe   : > { %p144_p9 = pnand %p917_p7, %p143_p8 }
  0x10   : > { %147 = sbr.rel (%p144_p9) target bundleno = 502 (0x1f6), region = 32 }
  0x15   : > { %s919_s25 = sshll.u32 %s1173_s2, 3  ;;  %v210_v0 = vlaneseq  ;;  %v207_v2 = vld [vmem:[%s1687_s1] sm:$0x3]  ;;  %vm255_vm0 = vcmask 1040384   ;;  %s208_s5 = sld [smem:[#allocation2]]  ;;  %vm718_vm1 = vcmask 1041409  }
  0x16   : > { %p169_p10 = scmp.lt.s32.totalorder %s919_s25, 15  ;;  %vm720_vm2 = vcmask 1042434   ;;  %vm722_vm3 = vcmask 1043459   ;;  %vm724_vm4 = vcmask 1044484   ;;  %vm726_vm5 = vcmask 1045509   ;;  %s165_s6 = sand.u32 1, %s1118_s15  }
  0x17   : > { %v211_v1 = vshrl.u32 %v210_v0, 7  ;;  %vm728_vm6 = vcmask 1046534   ;;  %vm730_vm7 = vcmask 1047559   ;;  %s1620_s7 = sshll.u32 %s165_s6, 4  ;;  %s928_s8 = sshll.u32 %s1173_s2, 8 }
  0x18   : > { %s1715_s25 = smov (!%p169_p10, %s919_s25), 15  ;;  %s167_s9 = scalar_lea.vmem [#allocation3], %s1620_s7 }
  0x19   : > { %v212_v3 = vsub.s32 0, %v211_v1  ;;  %v216_v4 = vsub.s32 1, %v211_v1  ;;  %s927_s28 = sshll.u32 %s1715_s25, 5  ;;  %s855_s10 = sshll.u32 %s167_s9, 4  ;;  %s856_s10 = int_to_ptr.vmem [resolvable:$true] %s855_s10 }
  0x1a   : > { %s1207_s4 = scalar_lea.vmem %s1686_s0, %s927_s28  ;;  %s1648_s13 = scalar_lea.hbm %s1689_s3, %s928_s8 }
  0x1b   : > { %v1209_v5 = vrot.slane %v207_v2, %v212_v3  ;;  %v1211_v6 = vrot.slane %v207_v2, %v216_v4  ;;  %v1214_v7 = vld [vmem:[%s1207_s4 + $0x10] sm:$0x1]  ;;  %v1217_v8 = vld [vmem:[%s1207_s4 + $0x18] sm:$0x1]  ;;  %v1220_v9 = vld [vmem:[%s1207_s4] sm:$0xff]  ;;  %s841_s2 = scalar_lea.sflag [#allocation4], %s165_s6 }
  0x1c   : > { %v1227_v12 = vld [vmem:[%s1207_s4 + $0x8] sm:$0xff]  ;;  %v1232_v14 = vld [vmem:[%s1207_s4 + $0x30] sm:$0x1]  ;;  %v1235_v15 = vld [vmem:[%s1207_s4 + $0x38] sm:$0x1]  ;;  %s1066_s18 = scalar_lea.vmem %s856_s10, 256 }
  0x1d   : > { %v222_v10 = vmul.f32 %v1209_v5, %v1214_v7  ;;  %v223_v11 = vmul.f32 %v1211_v6, %v1217_v8  ;;  %v220_v13 = vmul.f32 %v1209_v5, %v1220_v9  ;;  %v221_v16 = vmul.f32 %v1211_v6, %v1227_v12  ;;  %v1244_v19 = vld [vmem:[%s1207_s4 + $0x20] sm:$0xff]  ;;  %v1247_v20 = vld [vmem:[%s1207_s4 + $0x28] sm:$0xff]  ;;  %v1250_v21 = vld [vmem:[%s1207_s4 + $0x50] sm:$0x1]  ;;  %p1067_p11 = scmp.ne.s32.totalorder %s856_s10, %s1066_s18  ;;  %s1128_s20 = smov [#allocation3]  }
  0x1e   : > { %v226_v17 = vmul.f32 %v1209_v5, %v1232_v14  ;;  %v227_v18 = vmul.f32 %v1211_v6, %v1235_v15  ;;  %v224_v24 = vmul.f32 %v1209_v5, %v1244_v19  ;;  %v225_v25 = vmul.f32 %v1211_v6, %v1247_v20  ;;  %v1259_v26 = vld [vmem:[%s1207_s4 + $0x58] sm:$0x1]  ;;  %v1262_v27 = vld [vmem:[%s1207_s4 + $0x40] sm:$0xff]  ;;  %v1265_v28 = vld [vmem:[%s1207_s4 + $0x48] sm:$0xff]  ;;  %s1070_s21 = sshll.u32 %s1128_s20, 4  ;;  %s1071_s21 = int_to_ptr.vmem [resolvable:$false] %s1070_s21 }
  0x1f   : > { %v256_v22 = vsel %vm255_vm0, %v222_v10, 0.0  ;;  %v257_v23 = vsel %vm255_vm0, %v223_v11, 0.0  ;;  %v252_v30 = vadd.f32 %v221_v16, %v220_v13  ;;  %v1270_v33 = vld [vmem:[%s1207_s4 + $0x70] sm:$0x1]  ;;  %v1273_v34 = vld [vmem:[%s1207_s4 + $0x78] sm:$0x1]  ;;  %v230_v37 = vmul.f32 %v1209_v5, %v1250_v21  ;;  %p1068_p12 = pnand %p1067_p11, %p1190_p5  ;;  %p1073_p0 = scmp.lt.s32.totalorder %s856_s10, %s1071_s21 }
  0x20   : > { %v258_v29 = vadd.f32 %v257_v23, %v256_v22  ;;  %v264_v31 = vsel %vm255_vm0, %v226_v17, 0.0  ;;  %v265_v32 = vsel %vm255_vm0, %v227_v18, 0.0  ;;  %v261_v36 = vadd.f32 %v225_v25, %v224_v24  ;;  %v1286_v42 = vld [vmem:[%s1207_s4 + $0x60] sm:$0xff]  ;;  %v1289_v43 = vld [vmem:[%s1207_s4 + $0x68] sm:$0xff]  ;;  %v1296_v47 = vld [vmem:[%s1207_s4 + $0x90] sm:$0x1] }
  0x21   : > { %v266_v35 = vadd.f32 %v265_v32, %v264_v31  ;;  %v231_v38 = vmul.f32 %v1211_v6, %v1259_v26  ;;  %253 = vadd.xlane.f32.xlu1 %v252_v30  ;;  %v228_v39 = vmul.f32 %v1209_v5, %v1262_v27  ;;  %v229_v40 = vmul.f32 %v1211_v6, %v1265_v28  ;;  %v1299_v48 = vld [vmem:[%s1207_s4 + $0x98] sm:$0x1]  ;;  %v1312_v57 = vld [vmem:[%s1207_s4 + $0x80] sm:$0xff]  ;;  %v1315_v58 = vld [vmem:[%s1207_s4 + $0x88] sm:$0xff]  ;;  %p1069_p13 = pneg %p1068_p12  ;;  %s1072_s25 = scalar_lea.vmem %s1071_s21, 512 }
  0x22   : > { %259 = vadd.xlane.f32.xlu0 %v258_v29  ;;  %v234_v41 = vmul.f32 %v1209_v5, %v1270_v33  ;;  %v272_v44 = vsel %vm255_vm0, %v230_v37, 0.0  ;;  %v235_v46 = vmul.f32 %v1211_v6, %v1273_v34  ;;  %v232_v51 = vmul.f32 %v1209_v5, %v1286_v42  ;;  %v1318_v59 = vld [vmem:[%s1207_s4 + $0xb0] sm:$0x1]  ;;  %v1321_v60 = vld [vmem:[%s1207_s4 + $0xb8] sm:$0x1]  ;;  %v1334_v10 = vld [vmem:[%s1207_s4 + $0xa0] sm:$0xff]  ;;  %p1074_p1 = scmp.lt.s32.totalorder %s1072_s25, %s1066_s18 }
  0x23   : > { %v273_v45 = vsel %vm255_vm0, %v231_v38, 0.0  ;;  %v269_v50 = vadd.f32 %v229_v40, %v228_v39  ;;  %v233_v52 = vmul.f32 %v1211_v6, %v1289_v43  ;;  %v238_v55 = vmul.f32 %v1209_v5, %v1296_v47  ;;  %v1337_v11 = vld [vmem:[%s1207_s4 + $0xa8] sm:$0xff]  ;;  %v1340_v13 = vld [vmem:[%s1207_s4 + $0xd0] sm:$0x1]  ;;  %v1343_v16 = vld [vmem:[%s1207_s4 + $0xd8] sm:$0x1] }
  0x24   : > { %v274_v49 = vadd.f32 %v273_v45, %v272_v44  ;;  %v280_v53 = vsel %vm255_vm0, %v234_v41, 0.0  ;;  %v281_v54 = vsel %vm255_vm0, %v235_v46, 0.0  ;;  %v239_v56 = vmul.f32 %v1211_v6, %v1299_v48  ;;  %v1356_v31 = vld [vmem:[%s1207_s4 + $0xc0] sm:$0xff]  ;;  %v1359_v32 = vld [vmem:[%s1207_s4 + $0xc8] sm:$0xff]  ;;  %p1075_p2 = por %p1074_p1, %p1073_p0 }
  0x25   : > { %262 = vadd.xlane.f32.xlu1 %v261_v36  ;;  %v282_v61 = vadd.f32 %v281_v54, %v280_v53  ;;  %v277_v62 = vadd.f32 %v233_v52, %v232_v51  ;;  %v236_v63 = vmul.f32 %v1209_v5, %v1312_v57  ;;  %v237_v0 = vmul.f32 %v1211_v6, %v1315_v58  ;;  %v1365_v36 = vld [vmem:[%s1207_s4 + $0xf8] sm:$0x1] }
  0x26   : > { %267 = vadd.xlane.f32.xlu0 %v266_v35  ;;  %v288_v1 = vsel %vm255_vm0, %v238_v55, 0.0  ;;  %v289_v2 = vsel %vm255_vm0, %v239_v56, 0.0  ;;  %v242_v3 = vmul.f32 %v1209_v5, %v1318_v59  ;;  %v243_v4 = vmul.f32 %v1211_v6, %v1321_v60  ;;  %1698 = vst [vmem:[#allocation6_spill] sm:$0xff] %v1359_v32  ;;  %v1362_v35 = vld [vmem:[%s1207_s4 + $0xf0] sm:$0x1]  ;;  %1700 = vst [vmem:[#allocation8_spill] sm:$0xff] %v1365_v36  ;;  %p1076_p3 = pnand %p1075_p2, %p1069_p13 }
  0x27   : > { %v290_v17 = vadd.f32 %v289_v2, %v288_v1  ;;  %v285_v18 = vadd.f32 %v237_v0, %v236_v63  ;;  %v240_v22 = vmul.f32 %v1209_v5, %v1334_v10  ;;  %v241_v23 = vmul.f32 %v1211_v6, %v1337_v11  ;;  %1699 = vst [vmem:[#allocation7_spill] sm:$0xff] %v1362_v35 }
  0x28   : > { %v296_v24 = vsel %vm255_vm0, %v242_v3, 0.0  ;;  %v297_v25 = vsel %vm255_vm0, %v243_v4, 0.0  ;;  %v246_v29 = vmul.f32 %v1209_v5, %v1340_v13  ;;  %v247_v30 = vmul.f32 %v1211_v6, %v1343_v16 }
  0x29   : > { %270 = vadd.xlane.f32.xlu1 %v269_v50  ;;  %v298_v37 = vadd.f32 %v297_v25, %v296_v24  ;;  %v293_v38 = vadd.f32 %v241_v23, %v240_v22  ;;  %v244_v41 = vmul.f32 %v1209_v5, %v1356_v31  ;;  %v245_v44 = vmul.f32 %v1211_v6, %v1359_v32  ;;  %v1381_v50 = vld [vmem:[%s1207_s4 + $0xe8] sm:$0xff] }
  0x2a   : > { %275 = vadd.xlane.f32.xlu0 %v274_v49  ;;  %v304_v39 = vsel %vm255_vm0, %v246_v29, 0.0  ;;  %v305_v40 = vsel %vm255_vm0, %v247_v30, 0.0  ;;  %v250_v45 = vmul.f32 %v1209_v5, %v1362_v35  ;;  %v251_v46 = vmul.f32 %v1211_v6, %v1365_v36  ;;  %v1378_v49 = vld [vmem:[%s1207_s4 + $0xe0] sm:$0xff]  ;;  %1702 = vst [vmem:[#allocation10_spill] sm:$0xff] %v1381_v50 }
  0x2b   : > { %1701 = vst [vmem:[#allocation9_spill] sm:$0xff] %v1378_v49  ;;  %v306_v51 = vadd.f32 %v305_v40, %v304_v39  ;;  %v301_v52 = vadd.f32 %v245_v44, %v244_v41  ;;  %v248_v53 = vmul.f32 %v1209_v5, %v1378_v49  ;;  %v249_v54 = vmul.f32 %v1211_v6, %v1381_v50 }
  0x2c   : > { %v312_v55 = vsel %vm255_vm0, %v250_v45, 0.0  ;;  %v313_v56 = vsel %vm255_vm0, %v251_v46, 0.0  ;;  %v1389_v63 = vstv %s208_s5 }
  0x2d   : > { %278 = vadd.xlane.f32.xlu1 %v277_v62  ;;  %v309_v62 = vadd.f32 %v249_v54, %v248_v53 }
  0x2e   : > { %283 = vadd.xlane.f32.xlu0 %v282_v61  ;;  %v314_v61 = vadd.f32 %v313_v56, %v312_v55 }
  0x31   : > { %286 = vadd.xlane.f32.xlu1 %v285_v18 }
  0x32   : > { %291 = vadd.xlane.f32.xlu0 %v290_v17 }
  0x35   : > { %294 = vadd.xlane.f32.xlu1 %v293_v38 }
  0x36   : > { %299 = vadd.xlane.f32.xlu0 %v298_v37 }
  0x39   : > { %302 = vadd.xlane.f32.xlu1 %v301_v52 }
  0x3a   : > { %307 = vadd.xlane.f32.xlu0 %v306_v51 }
  0x3d   : > { %310 = vadd.xlane.f32.xlu1 %v309_v62 }
  0x3e   : > { %315 = vadd.xlane.f32.xlu0 %v314_v61 }
  0xaa   : > { %v254_v1 = vpop.xlane.xlu1 %253 }
  0xab   : > { %v260_v0 = vpop.xlane.xlu0 %259  ;;  %v318_v2 = vadd.f32 %v1389_v63, %v254_v1 }
  0xac   : > { %v319_v5 = vadd.f32 %v1389_v63, %v260_v0 }
  0xad   : > { %v334_v3 = vsub.f32 0.0, %v318_v2 }
  0xae   : > { %v335_v6 = vsub.f32 0.0, %v319_v5  ;;  %v263_v17 = vpop.xlane.xlu1 %262 }
  0xaf   : > { %v268_v4 = vpop.xlane.xlu0 %267  ;;  %v350_v22 = vmul.f32 1.442695, %v334_v3  ;;  %v320_v24 = vadd.f32 %v1389_v63, %v263_v17 }
  0xb0   : > { %v352_v18 = vmul.f32 1.442695, %v335_v6  ;;  %v321_v23 = vadd.f32 %v1389_v63, %v268_v4 }
  0xb1   : > { %v336_v29 = vsub.f32 0.0, %v320_v24 }
  0xb2   : > { %968 = vpow2.f32 %v352_v18  ;;  %v337_v25 = vsub.f32 0.0, %v321_v23  ;;  %v271_v37 = vpop.xlane.xlu1 %270 }
  0xb3   : > { %970 = vpow2.f32 %v350_v22  ;;  %v276_v30 = vpop.xlane.xlu0 %275  ;;  %v354_v39 = vmul.f32 1.442695, %v336_v29  ;;  %v322_v41 = vadd.f32 %v1389_v63, %v271_v37 }
  0xb4   : > { %v356_v38 = vmul.f32 1.442695, %v337_v25  ;;  %v323_v40 = vadd.f32 %v1389_v63, %v276_v30 }
  0xb5   : > { %v338_v45 = vsub.f32 0.0, %v322_v41 }
  0xb6   : > { %972 = vpow2.f32 %v356_v38  ;;  %v339_v44 = vsub.f32 0.0, %v323_v40  ;;  %v279_v51 = vpop.xlane.xlu1 %278 }
  0xb7   : > { %974 = vpow2.f32 %v354_v39  ;;  %v284_v46 = vpop.xlane.xlu0 %283  ;;  %v358_v53 = vmul.f32 1.442695, %v338_v45  ;;  %v324_v55 = vadd.f32 %v1389_v63, %v279_v51 }
  0xb8   : > { %v360_v52 = vmul.f32 1.442695, %v339_v44  ;;  %v325_v54 = vadd.f32 %v1389_v63, %v284_v46 }
  0xb9   : > { %v340_v61 = vsub.f32 0.0, %v324_v55 }
  0xba   : > { %976 = vpow2.f32 %v360_v52  ;;  %v341_v56 = vsub.f32 0.0, %v325_v54  ;;  %v287_v0 = vpop.xlane.xlu1 %286 }
  0xbb   : > { %978 = vpow2.f32 %v358_v53  ;;  %v292_v62 = vpop.xlane.xlu0 %291  ;;  %v362_v5 = vmul.f32 1.442695, %v340_v61  ;;  %v326_v6 = vadd.f32 %v1389_v63, %v287_v0 }
  0xbc   : > { %v364_v1 = vmul.f32 1.442695, %v341_v56  ;;  %v327_v2 = vadd.f32 %v1389_v63, %v292_v62 }
  0xbd   : > { %v342_v4 = vsub.f32 0.0, %v326_v6 }
  0xbe   : > { %980 = vpow2.f32 %v364_v1  ;;  %v343_v3 = vsub.f32 0.0, %v327_v2  ;;  %v295_v22 = vpop.xlane.xlu1 %294 }
  0xbf   : > { %v969_v17 = vpop.eup %968  ;;  %982 = vpow2.f32 %v362_v5  ;;  %v300_v18 = vpop.xlane.xlu0 %299  ;;  %v366_v37 = vmul.f32 1.442695, %v342_v4  ;;  %v328_v38 = vadd.f32 %v1389_v63, %v295_v22 }
  0xc0   : > { %v971_v23 = vpop.eup %970  ;;  %v383_v24 = vadd.f32 1.0, %v969_v17  ;;  %v368_v25 = vmul.f32 1.442695, %v343_v3  ;;  %v329_v29 = vadd.f32 %v1389_v63, %v300_v18 }
  0xc1   : > { %v382_v30 = vadd.f32 1.0, %v971_v23  ;;  %v344_v41 = vsub.f32 0.0, %v328_v38 }
  0xc2   : > { %984 = vrcp.f32 %v383_v24  ;;  %v345_v39 = vsub.f32 0.0, %v329_v29  ;;  %v303_v45 = vpop.xlane.xlu1 %302 }
  0xc3   : > { %v973_v40 = vpop.eup %972  ;;  %986 = vrcp.f32 %v382_v30  ;;  %v308_v44 = vpop.xlane.xlu0 %307  ;;  %v370_v55 = vmul.f32 1.442695, %v344_v41  ;;  %v330_v56 = vadd.f32 %v1389_v63, %v303_v45 }
  0xc4   : > { %v975_v46 = vpop.eup %974  ;;  %v385_v51 = vadd.f32 1.0, %v973_v40  ;;  %988 = vpow2.f32 %v368_v25  ;;  %v372_v52 = vmul.f32 1.442695, %v345_v39  ;;  %v331_v53 = vadd.f32 %v1389_v63, %v308_v44 }
  0xc5   : > { %v384_v54 = vadd.f32 1.0, %v975_v46  ;;  %990 = vpow2.f32 %v366_v37  ;;  %v346_v0 = vsub.f32 0.0, %v330_v56 }
  0xc6   : > { %992 = vrcp.f32 %v385_v51  ;;  %v347_v61 = vsub.f32 0.0, %v331_v53  ;;  %v311_v5 = vpop.xlane.xlu1 %310 }
  0xc7   : > { %v977_v62 = vpop.eup %976  ;;  %994 = vrcp.f32 %v384_v54  ;;  %v316_v1 = vpop.xlane.xlu0 %315  ;;  %v374_v18 = vmul.f32 1.442695, %v346_v0  ;;  %v332_v22 = vadd.f32 %v1389_v63, %v311_v5 }
  0xc8   : > { %v979_v2 = vpop.eup %978  ;;  %v387_v6 = vadd.f32 1.0, %v977_v62  ;;  %996 = vpow2.f32 %v372_v52  ;;  %v376_v3 = vmul.f32 1.442695, %v347_v61  ;;  %v333_v4 = vadd.f32 %v1389_v63, %v316_v1 }
  0xc9   : > { %v386_v17 = vadd.f32 1.0, %v979_v2  ;;  %998 = vpow2.f32 %v370_v55  ;;  %v348_v25 = vsub.f32 0.0, %v332_v22 }
  0xca   : > { %1000 = vrcp.f32 %v387_v6  ;;  %v349_v23 = vsub.f32 0.0, %v333_v4 }
  0xcb   : > { %v981_v24 = vpop.eup %980  ;;  %1002 = vrcp.f32 %v386_v17  ;;  %v378_v39 = vmul.f32 1.442695, %v348_v25 }
  0xcc   : > { %v983_v29 = vpop.eup %982  ;;  %v389_v30 = vadd.f32 1.0, %v981_v24  ;;  %1004 = vpow2.f32 %v376_v3  ;;  %v380_v37 = vmul.f32 1.442695, %v349_v23 }
  0xcd   : > { %v388_v38 = vadd.f32 1.0, %v983_v29  ;;  %1006 = vpow2.f32 %v374_v18 }
  0xce   : > { %1008 = vrcp.f32 %v389_v30 }
  0xcf   : > { %v1407_v40 = vpop.eup %984  ;;  %1010 = vrcp.f32 %v388_v38 }
  0xd0   : > { %v1409_v41 = vpop.eup %986  ;;  %v430_v63 = vsel %vm255_vm0, %v1407_v40, 0.0  ;;  %1012 = vpow2.f32 %v380_v37 }
  0xd1   : > { %v989_v44 = vpop.eup %988  ;;  %v431_v45 = vadd.f32 %v1409_v41, %v430_v63  ;;  %1014 = vpow2.f32 %v378_v39 }
  0xd2   : > { %v991_v46 = vpop.eup %990  ;;  %v391_v51 = vadd.f32 1.0, %v989_v44 }
  0xd3   : > { %v1414_v52 = vpop.eup %992  ;;  %v432_v53 = vrot.slane %v431_v45, 4  ;;  %v390_v54 = vadd.f32 1.0, %v991_v46 }
  0xd4   : > { %v1416_v55 = vpop.eup %994  ;;  %v438_v56 = vsel %vm255_vm0, %v1414_v52, 0.0  ;;  %1016 = vrcp.f32 %v391_v51 }
  0xd5   : > { %v997_v61 = vpop.eup %996  ;;  %v433_v62 = vadd.f32 %v432_v53, %v431_v45  ;;  %v439_v0 = vadd.f32 %v1416_v55, %v438_v56  ;;  %1018 = vrcp.f32 %v390_v54 }
  0xd6   : > { %v999_v1 = vpop.eup %998  ;;  %v393_v5 = vadd.f32 1.0, %v997_v61 }
  0xd7   : > { %v1421_v2 = vpop.eup %1000  ;;  %v434_v6 = vrot.slane %v433_v62, 2  ;;  %v440_v3 = vrot.slane %v439_v0, 4  ;;  %v392_v4 = vadd.f32 1.0, %v999_v1 }
  0xd8   : > { %v1423_v17 = vpop.eup %1002  ;;  %v446_v18 = vsel %vm255_vm0, %v1421_v2, 0.0  ;;  %1020 = vrcp.f32 %v393_v5 }
  0xd9   : > { %v1005_v22 = vpop.eup %1004  ;;  %v435_v23 = vadd.f32 %v434_v6, %v433_v62  ;;  %v441_v24 = vadd.f32 %v440_v3, %v439_v0  ;;  %v447_v25 = vadd.f32 %v1423_v17, %v446_v18  ;;  %1022 = vrcp.f32 %v392_v4 }
  0xda   : > { %v1007_v29 = vpop.eup %1006  ;;  %v395_v30 = vadd.f32 1.0, %v1005_v22 }
  0xdb   : > { %v1428_v37 = vpop.eup %1008  ;;  %v436_v38 = vrot.slane %v435_v23, 1  ;;  %v442_v39 = vrot.slane %v441_v24, 2  ;;  %v448_v63 = vrot.slane %v447_v25, 4  ;;  %v394_v44 = vadd.f32 1.0, %v1007_v29 }
  0xdc   : > { %v1430_v45 = vpop.eup %1010  ;;  %v454_v46 = vsel %vm255_vm0, %v1428_v37, 0.0  ;;  %1024 = vrcp.f32 %v395_v30 }
  0xdd   : > { %v1013_v51 = vpop.eup %1012  ;;  %v437_v53 = vadd.f32 %v436_v38, %v435_v23  ;;  %v443_v54 = vadd.f32 %v442_v39, %v441_v24  ;;  %v449_v56 = vadd.f32 %v448_v63, %v447_v25  ;;  %v455_v61 = vadd.f32 %v1430_v45, %v454_v46 }
  0xde   : > { %v1015_v62 = vpop.eup %1014  ;;  %1026 = vrcp.f32 %v394_v44  ;;  %v397_v0 = vadd.f32 1.0, %v1013_v51 }
  0xdf   : > { %v494_v1 = vadd.f32 1e-08, %v437_v53  ;;  %v444_v5 = vrot.slane %v443_v54, 1  ;;  %v450_v6 = vrot.slane %v449_v56, 2  ;;  %v456_v3 = vrot.slane %v455_v61, 4 }
  0xe0   : > { %1028 = vrcp.f32 %v397_v0  ;;  %v396_v4 = vadd.f32 1.0, %v1015_v62 }
  0xe1   : > { %v1435_v18 = vpop.eup %1016  ;;  %1030 = vrcp.f32 %v494_v1  ;;  %v445_v22 = vadd.f32 %v444_v5, %v443_v54  ;;  %v451_v29 = vadd.f32 %v450_v6, %v449_v56  ;;  %v457_v30 = vadd.f32 %v456_v3, %v455_v61 }
  0xe2   : > { %v1437_v23 = vpop.eup %1018  ;;  %v462_v24 = vsel %vm255_vm0, %v1435_v18, 0.0  ;;  %1032 = vrcp.f32 %v396_v4 }
  0xe3   : > { %v495_v25 = vadd.f32 1e-08, %v445_v22  ;;  %v452_v38 = vrot.slane %v451_v29, 1  ;;  %v458_v39 = vrot.slane %v457_v30, 2  ;;  %v463_v63 = vadd.f32 %v1437_v23, %v462_v24 }
  0xe5   : > { %v1442_v44 = vpop.eup %1020  ;;  %1034 = vrcp.f32 %v495_v25  ;;  %v453_v46 = vadd.f32 %v452_v38, %v451_v29  ;;  %v459_v51 = vadd.f32 %v458_v39, %v457_v30  ;;  %v464_v53 = vrot.slane %v463_v63, 4 }
  0xe6   : > { %v1444_v54 = vpop.eup %1022  ;;  %v470_v56 = vsel %vm255_vm0, %v1442_v44, 0.0 }
  0xe7   : > { %v496_v61 = vadd.f32 1e-08, %v453_v46  ;;  %v460_v62 = vrot.slane %v459_v51, 1  ;;  %v465_v0 = vadd.f32 %v464_v53, %v463_v63  ;;  %v471_v1 = vadd.f32 %v1444_v54, %v470_v56 }
  0xe9   : > { %v1449_v5 = vpop.eup %1024  ;;  %1036 = vrcp.f32 %v496_v61  ;;  %v461_v6 = vadd.f32 %v460_v62, %v459_v51  ;;  %v466_v3 = vrot.slane %v465_v0, 2  ;;  %v472_v4 = vrot.slane %v471_v1, 4 }
  0xea   : > { %v478_v22 = vsel %vm255_vm0, %v1449_v5, 0.0 }
  0xeb   : > { %v1453_v29 = vpop.eup %1026  ;;  %v497_v30 = vadd.f32 1e-08, %v461_v6  ;;  %v467_v24 = vadd.f32 %v466_v3, %v465_v0  ;;  %v473_v25 = vadd.f32 %v472_v4, %v471_v1 }
  0xec   : > { %v479_v38 = vadd.f32 %v1453_v29, %v478_v22 }
  0xed   : > { %v1456_v39 = vpop.eup %1028  ;;  %1038 = vrcp.f32 %v497_v30  ;;  %v468_v63 = vrot.slane %v467_v24, 1  ;;  %v474_v46 = vrot.slane %v473_v25, 2 }
  0xee   : > { %1703 = vst [vmem:[#allocation11_spill] sm:$0xff] %v1456_v39  ;;  %v1031_v53 = vpop.eup %1030  ;;  %v480_v56 = vrot.slane %v479_v38, 4  ;;  %v486_v51 = vsel %vm255_vm0, %v1456_v39, 0.0 }
  0xef   : > { %v1460_v61 = vpop.eup %1032  ;;  %v503_v62 = vmul.f32 %v1031_v53, %v1409_v41  ;;  %v504_v6 = vmul.f32 %v1031_v53, %v1407_v40  ;;  %v469_v0 = vadd.f32 %v468_v63, %v467_v24  ;;  %v475_v1 = vadd.f32 %v474_v46, %v473_v25 }
  0xf0   : > { %v481_v3 = vadd.f32 %v480_v56, %v479_v38  ;;  %v487_v4 = vadd.f32 %v1460_v61, %v486_v51 }
  0xf1   : > { %v526_v22 = vmul.f32 %v503_v62, %v1220_v9  ;;  %v527_v30 = vmul.f32 %v503_v62, %v1227_v12  ;;  %v528_v36 = vmul.f32 %v504_v6, %v1214_v7  ;;  %v529_v35 = vmul.f32 %v504_v6, %v1217_v8 }
  0xf2   : > { %v1035_v50 = vpop.eup %1034  ;;  %v498_v49 = vadd.f32 1e-08, %v469_v0  ;;  %v476_v39 = vrot.slane %v475_v1, 1  ;;  %v482_v32 = vrot.slane %v481_v3, 2  ;;  %v488_v41 = vrot.slane %v487_v4, 4 }
  0xf3   : > { %v558_v40 = vsel %vm255_vm0, %v528_v36, 0.0  ;;  %v566_v24 = vsel %vm255_vm0, %v529_v35, 0.0  ;;  %v506_v25 = vmul.f32 %v1035_v50, %v1416_v55  ;;  %v507_v38 = vmul.f32 %v1035_v50, %v1414_v52 }
  0xf4   : > { %v559_v9 = vadd.f32 %v558_v40, %v526_v22  ;;  %v567_v63 = vadd.f32 %v566_v24, %v527_v30  ;;  %1040 = vrcp.f32 %v498_v49  ;;  %v477_v12 = vadd.f32 %v476_v39, %v475_v1 }
  0xf5   : > { %v530_v7 = vmul.f32 %v506_v25, %v1244_v19  ;;  %v531_v8 = vmul.f32 %v506_v25, %v1247_v20  ;;  %v532_v46 = vmul.f32 %v507_v38, %v1232_v14  ;;  %v533_v53 = vmul.f32 %v507_v38, %v1235_v15 }
  0xf6   : > { %v1037_v56 = vpop.eup %1036  ;;  %v560_v36 = vrot.slane %v559_v9, 4  ;;  %v568_v51 = vrot.slane %v567_v63, 4  ;;  %v499_v35 = vadd.f32 1e-08, %v477_v12  ;;  %v483_v62 = vadd.f32 %v482_v32, %v481_v3 }
  0xf7   : > { %v574_v55 = vsel %vm255_vm0, %v532_v46, 0.0  ;;  %v582_v50 = vsel %vm255_vm0, %v533_v53, 0.0  ;;  %v509_v49 = vmul.f32 %v1037_v56, %v1423_v17  ;;  %v510_v52 = vmul.f32 %v1037_v56, %v1421_v2 }
  0xf8   : > { %v561_v19 = vadd.f32 %v560_v36, %v559_v9  ;;  %v575_v39 = vadd.f32 %v574_v55, %v530_v7  ;;  %v583_v20 = vadd.f32 %v582_v50, %v531_v8  ;;  %1042 = vrcp.f32 %v499_v35 }
  0xf9   : > { %v534_v14 = vmul.f32 %v509_v49, %v1262_v27  ;;  %v535_v15 = vmul.f32 %v509_v49, %v1265_v28  ;;  %v536_v6 = vmul.f32 %v510_v52, %v1250_v21  ;;  %v537_v0 = vmul.f32 %v510_v52, %v1259_v26 }
  0xfa   : > { %v1039_v32 = vpop.eup %1038  ;;  %v576_v1 = vrot.slane %v575_v39, 4  ;;  %v584_v3 = vrot.slane %v583_v20, 4  ;;  %v484_v22 = vrot.slane %v483_v62, 1  ;;  %v569_v30 = vadd.f32 %v568_v51, %v567_v63 }
  0xfb   : > { %v590_v17 = vsel %vm255_vm0, %v536_v6, 0.0  ;;  %v598_v2 = vsel %vm255_vm0, %v537_v0, 0.0  ;;  %v489_v40 = vadd.f32 %v488_v41, %v487_v4  ;;  %v512_v28 = vmul.f32 %v1039_v32, %v1430_v45 }
  0xfc   : > { %v577_v24 = vadd.f32 %v576_v1, %v575_v39  ;;  %v585_v25 = vadd.f32 %v584_v3, %v583_v20  ;;  %v591_v27 = vadd.f32 %v590_v17, %v534_v14  ;;  %v485_v38 = vadd.f32 %v484_v22, %v483_v62 }
  0xfd   : > { %v490_v21 = vrot.slane %v489_v40, 2  ;;  %v599_v26 = vadd.f32 %v598_v2, %v535_v15  ;;  %v513_v12 = vmul.f32 %v1039_v32, %v1428_v37  ;;  %v562_v7 = vrot.slane %v561_v19, 2 }
  0xfe   : > { %v592_v9 = vrot.slane %v591_v27, 4  ;;  %v500_v8 = vadd.f32 1e-08, %v485_v38  ;;  %v570_v63 = vrot.slane %v569_v30, 2  ;;  %v578_v53 = vrot.slane %v577_v24, 2 }
  0xff   : > { %v491_v46 = vadd.f32 %v490_v21, %v489_v40  ;;  %v563_v56 = vadd.f32 %v562_v7, %v561_v19  ;;  %v586_v36 = vrot.slane %v585_v25, 2  ;;  %v600_v45 = vrot.slane %v599_v26, 4 }
 0x100   : > { %1044 = vrcp.f32 %v500_v8  ;;  %v571_v41 = vadd.f32 %v570_v63, %v569_v30  ;;  %v1489_v35 = vadd.f32 %v578_v53, %v577_v24  ;;  %v540_v37 = vmul.f32 %v513_v12, %v1270_v33 }
 0x101   : > { %v1041_v51 = vpop.eup %1040  ;;  %v492_v4 = vrot.slane %v491_v46, 1  ;;  %v538_v50 = vmul.f32 %v512_v28, %v1286_v42  ;;  %v541_v52 = vmul.f32 %v513_v12, %v1273_v34  ;;  %v593_v19 = vadd.f32 %v592_v9, %v591_v27 }
 0x102   : > { %v515_v62 = vmul.f32 %v1041_v51, %v1437_v23  ;;  %v516_v55 = vmul.f32 %v1041_v51, %v1435_v18  ;;  %v539_v39 = vmul.f32 %v512_v28, %v1289_v43  ;;  %v564_v14 = vrot.slane %v563_v56, 1 }
 0x103   : > { %v493_v49 = vadd.f32 %v492_v4, %v491_v46  ;;  %v587_v15 = vadd.f32 %v586_v36, %v585_v25  ;;  %v572_v23 = vrot.slane %v571_v41, 1  ;;  %v580_v18 = vrot.slane %v1489_v35, 1 }
 0x104   : > { %v544_v20 = vmul.f32 %v516_v55, %v1296_v47  ;;  %v542_v6 = vmul.f32 %v515_v62, %v1312_v57  ;;  %v543_v33 = vmul.f32 %v515_v62, %v1315_v58  ;;  %v594_v32 = vrot.slane %v593_v19, 2 }
 0x105   : > { %v501_v0 = vadd.f32 1e-08, %v493_v49  ;;  %v601_v42 = vadd.f32 %v600_v45, %v599_v26  ;;  %v606_v1 = vsel %vm255_vm0, %v540_v37, 0.0  ;;  %v1043_v34 = vpop.eup %1042  ;;  %v614_v43 = vsel %vm255_vm0, %v541_v52, 0.0 }
 0x106   : > { %v607_v3 = vadd.f32 %v606_v1, %v538_v50  ;;  %v622_v47 = vsel %vm255_vm0, %v544_v20, 0.0  ;;  %v518_v22 = vmul.f32 %v1043_v34, %v1444_v54  ;;  %v519_v57 = vmul.f32 %v1043_v34, %v1442_v44  ;;  %v1705_v1 = vld [vmem:[#allocation11_spill] sm:$0xff] }
 0x107   : > { %1046 = vrcp.f32 %v501_v0  ;;  %v545_v30 = vmul.f32 %v516_v55, %v1299_v48  ;;  %v1507_v17 = vadd.f32 %v564_v14, %v563_v56  ;;  %v595_v58 = vadd.f32 %v594_v32, %v593_v19 }
 0x108   : > { %v608_v2 = vrot.slane %v607_v3, 4  ;;  %v615_v40 = vadd.f32 %v614_v43, %v539_v39  ;;  %v623_v24 = vadd.f32 %v622_v47, %v542_v6  ;;  %v546_v25 = vmul.f32 %v518_v22, %v1334_v10 }
 0x109   : > { %v548_v27 = vmul.f32 %v519_v57, %v1318_v59  ;;  %v549_v28 = vmul.f32 %v519_v57, %v1321_v60  ;;  %v602_v38 = vrot.slane %v601_v42, 2  ;;  %v547_v21 = vmul.f32 %v518_v22, %v1337_v11  ;;  %v1706_v57 = vld [vmem:[#allocation9_spill] sm:$0xff] }
 0x10a   : > { %v1513_v54 = vadd.f32 %v572_v23, %v571_v41  ;;  %v609_v44 = vadd.f32 %v608_v2, %v607_v3  ;;  %v616_v9 = vrot.slane %v615_v40, 4  ;;  %v624_v48 = vrot.slane %v623_v24, 4 }
 0x10b   : > { %v630_v26 = vsel %vm255_vm0, %v545_v30, 0.0  ;;  %v638_v12 = vsel %vm255_vm0, %v548_v27, 0.0  ;;  %v646_v7 = vsel %vm255_vm0, %v549_v28, 0.0  ;;  %v588_v8 = vrot.slane %v587_v15, 1 }
 0x10c   : > { %v596_v10 = vrot.slane %v595_v58, 1  ;;  %v610_v46 = vrot.slane %v609_v44, 2  ;;  %v617_v59 = vadd.f32 %v616_v9, %v615_v40  ;;  %v603_v60 = vadd.f32 %v602_v38, %v601_v42  ;;  %v1708_v40 = vld [vmem:[#allocation7_spill] sm:$0xff] }
 0x10d   : > { %v1045_v63 = vpop.eup %1044  ;;  %v625_v53 = vadd.f32 %v624_v48, %v623_v24  ;;  %v631_v56 = vadd.f32 %v630_v26, %v543_v33  ;;  %v639_v11 = vadd.f32 %v638_v12, %v546_v25  ;;  %v647_v41 = vadd.f32 %v646_v7, %v547_v21  ;;  %v1709_v25 = vld [vmem:[#allocation8_spill] sm:$0xff] }
 0x10e   : > { %v521_v36 = vmul.f32 %v1045_v63, %v1453_v29  ;;  %v522_v51 = vmul.f32 %v1045_v63, %v1449_v5  ;;  %v611_v4 = vadd.f32 %v610_v46, %v609_v44  ;;  %v618_v45 = vrot.slane %v617_v59, 2 }
 0x10f   : > { %v626_v62 = vrot.slane %v625_v53, 2  ;;  %v632_v55 = vrot.slane %v631_v56, 4  ;;  %v640_v37 = vrot.slane %v639_v11, 4  ;;  %v1522_v49 = vadd.f32 %v580_v18, %v1489_v35 }
 0x110   : > { %v552_v50 = vmul.f32 %v522_v51, %v1340_v13  ;;  %v1524_v52 = vadd.f32 %v588_v8, %v587_v15  ;;  %v1526_v19 = vadd.f32 %v596_v10, %v595_v58  ;;  %v550_v39 = vmul.f32 %v521_v36, %v1356_v31  ;;  %v1704_v13 = vld [vmem:[#allocation6_spill] sm:$0xff] }
 0x111   : > { %v553_v29 = vmul.f32 %v522_v51, %v1343_v16  ;;  %v619_v5 = vadd.f32 %v618_v45, %v617_v59  ;;  %v633_v20 = vadd.f32 %v632_v55, %v631_v56  ;;  %v604_v14 = vrot.slane %v603_v60, 1  ;;  %v1707_v58 = vld [vmem:[#allocation10_spill] sm:$0xff] }
 0x112   : > { %v641_v6 = vadd.f32 %v640_v37, %v639_v11  ;;  %v648_v0 = vrot.slane %v647_v41, 4  ;;  %v654_v23 = vsel %vm255_vm0, %v552_v50, 0.0  ;;  %v551_v32 = vmul.f32 %v521_v36, %v1704_v13 }
 0x113   : > { %v612_v35 = vrot.slane %v611_v4, 1  ;;  %v627_v18 = vadd.f32 %v626_v62, %v625_v53  ;;  %v634_v15 = vrot.slane %v633_v20, 2  ;;  %v620_v16 = vrot.slane %v619_v5, 1 }
 0x114   : > { %v1047_v33 = vpop.eup %1046  ;;  %v642_v31 = vrot.slane %v641_v6, 2  ;;  %v649_v3 = vadd.f32 %v648_v0, %v647_v41  ;;  %v655_v47 = vadd.f32 %v654_v23, %v550_v39  ;;  %v662_v22 = vsel %vm255_vm0, %v553_v29, 0.0 }
 0x115   : > { %v524_v42 = vmul.f32 %v1047_v33, %v1460_v61  ;;  %v525_v34 = vmul.f32 %v1047_v33, %v1705_v1  ;;  %v635_v43 = vadd.f32 %v634_v15, %v633_v20  ;;  %v628_v28 = vrot.slane %v627_v18, 1 }
 0x116   : > { %v643_v38 = vadd.f32 %v642_v31, %v641_v6  ;;  %v650_v61 = vrot.slane %v649_v3, 2  ;;  %v656_v21 = vrot.slane %v655_v47, 4  ;;  %v1539_v44 = vadd.f32 %v604_v14, %v603_v60 }
 0x117   : > { %v554_v30 = vmul.f32 %v524_v42, %v1706_v57  ;;  %v555_v2 = vmul.f32 %v524_v42, %v1707_v58  ;;  %v556_v24 = vmul.f32 %v525_v34, %v1708_v40  ;;  %v557_v27 = vmul.f32 %v525_v34, %v1709_v25 }
 0x118   : > { %v663_v9 = vadd.f32 %v662_v22, %v551_v32  ;;  %v636_v12 = vrot.slane %v635_v43, 1  ;;  %v644_v7 = vrot.slane %v643_v38, 1  ;;  %v651_v8 = vadd.f32 %v650_v61, %v649_v3 }
 0x119   : > { %v670_v48 = vsel %vm255_vm0, %v556_v24, 0.0  ;;  %v678_v26 = vsel %vm255_vm0, %v557_v27, 0.0  ;;  %v657_v10 = vadd.f32 %v656_v21, %v655_v47  ;;  %v1543_v46 = vadd.f32 %v612_v35, %v611_v4 }
 0x11a   : > { %v664_v59 = vrot.slane %v663_v9, 4  ;;  %v671_v63 = vadd.f32 %v670_v48, %v554_v30  ;;  %v679_v53 = vadd.f32 %v678_v26, %v555_v2  ;;  %v1545_v56 = vadd.f32 %v620_v16, %v619_v5 }
 0x11b   : > { %v1547_v60 = vadd.f32 %v628_v28, %v627_v18  ;;  %v652_v11 = vrot.slane %v651_v8, 1  ;;  %v658_v36 = vrot.slane %v657_v10, 2  ;;  %v686_v62 = vmul.f32 %v1507_v17, %v1507_v17 }
 0x11c   : > { %v665_v51 = vadd.f32 %v664_v59, %v663_v9  ;;  %v672_v41 = vrot.slane %v671_v63, 4  ;;  %v680_v45 = vrot.slane %v679_v53, 4  ;;  %v1551_v55 = vadd.f32 %v636_v12, %v635_v43 }
 0x11d   : > { %v1553_v4 = vadd.f32 %v644_v7, %v643_v38  ;;  %v659_v37 = vadd.f32 %v658_v36, %v657_v10  ;;  %v687_v50 = vmul.f32 %v1513_v54, %v1513_v54  ;;  %v688_v20 = vmul.f32 %v1522_v49, %v1522_v49 }
 0x11e   : > { %v666_v39 = vrot.slane %v665_v51, 2  ;;  %v673_v29 = vadd.f32 %v672_v41, %v671_v63  ;;  %v681_v5 = vadd.f32 %v680_v45, %v679_v53  ;;  %v1559_v14 = vadd.f32 %v652_v11, %v651_v8 }
 0x11f   : > { %v660_v6 = vrot.slane %v659_v37, 1  ;;  %v689_v0 = vmul.f32 %v1524_v52, %v1524_v52  ;;  %v690_v23 = vmul.f32 %v1526_v19, %v1526_v19  ;;  %v691_v35 = vmul.f32 %v1539_v44, %v1539_v44 }
 0x120   : > { %v667_v33 = vadd.f32 %v666_v39, %v665_v51  ;;  %v674_v13 = vrot.slane %v673_v29, 2  ;;  %v682_v32 = vrot.slane %v681_v5, 2  ;;  %v692_v15 = vmul.f32 %v1543_v46, %v1543_v46 }
 0x121   : > { %v1567_v18 = vadd.f32 %v660_v6, %v659_v37  ;;  %v693_v42 = vmul.f32 %v1545_v56, %v1545_v56  ;;  %v694_v1 = vmul.f32 %v1547_v60, %v1547_v60  ;;  %v695_v16 = vmul.f32 %v1551_v55, %v1551_v55 }
 0x122   : > { %v668_v34 = vrot.slane %v667_v33, 1  ;;  %v675_v31 = vadd.f32 %v674_v13, %v673_v29  ;;  %v683_v3 = vadd.f32 %v682_v32, %v681_v5  ;;  %v696_v43 = vmul.f32 %v1553_v4, %v1553_v4 }
 0x123   : > { %v697_v47 = vmul.f32 %v1559_v14, %v1559_v14  ;;  %v719_v22 = vsel %vm718_vm1, %v688_v20, %v686_v62  ;;  %v732_v57 = vsel %vm718_vm1, %v689_v0, %v687_v50  ;;  %v698_v24 = vmul.f32 %v1567_v18, %v1567_v18 }
 0x124   : > { %v1583_v30 = vadd.f32 %v668_v34, %v667_v33  ;;  %v676_v58 = vrot.slane %v675_v31, 1  ;;  %v684_v2 = vrot.slane %v683_v3, 1  ;;  %v721_v40 = vsel %vm720_vm2, %v690_v23, %v719_v22 }
 0x125   : > { %v723_v25 = vsel %vm722_vm3, %v692_v15, %v721_v40  ;;  %v733_v27 = vsel %vm720_vm2, %v691_v35, %v732_v57 }
 0x126   : > { %v1590_v28 = vadd.f32 %v676_v58, %v675_v31  ;;  %v1592_v38 = vadd.f32 %v684_v2, %v683_v3  ;;  %v699_v61 = vmul.f32 %v1583_v30, %v1583_v30  ;;  %v734_v21 = vsel %vm722_vm3, %v693_v42, %v733_v27 }
 0x127   : > { %v725_v9 = vsel %vm724_vm4, %v694_v1, %v723_v25  ;;  %v735_v48 = vsel %vm724_vm4, %v695_v16, %v734_v21 }
 0x128   : > { %v700_v26 = vmul.f32 %v1590_v28, %v1590_v28  ;;  %v701_v12 = vmul.f32 %v1592_v38, %v1592_v38  ;;  %v727_v7 = vsel %vm726_vm5, %v696_v43, %v725_v9  ;;  %v736_v8 = vsel %vm726_vm5, %v697_v47, %v735_v48 }
 0x129   : > { %v729_v10 = vsel %vm728_vm6, %v698_v24, %v727_v7  ;;  %v737_v59 = vsel %vm728_vm6, %v699_v61, %v736_v8 }
 0x12a   : > { %v731_v63 = vsel %vm730_vm7, %v700_v26, %v729_v10  ;;  %v738_v53 = vsel %vm730_vm7, %v701_v12, %v737_v59 }
 0x12b   : > { %v741_v11 = vadd.f32 %v738_v53, %v731_v63 }
 0x12d   : > { %742 = vadd.xlane.f32.xlu0 %v741_v11 }
 0x1b6   : > { %v743_v36 = vpop.xlane.xlu0 %742 }
 0x1b7   : > { %1048 = vrsqrt.f32 %v743_v36  ;;  %vm746_vm8 = vcmp.eq.f32.partialorder %v743_v36, inf  ;;  %v749_v45 = vand.u32 2147483648, %v743_v36  ;;  %vm748_vm9 = vcmp.eq.f32.partialorder %v743_v36, 0.0 }
 0x1c4   : > { %v1049_v51 = vpop.eup %1048 }
 0x1c5   : > { %v745_v41 = vmul.f32 %v1049_v51, %v743_v36 }
 0x1c7   : > { %v747_v62 = vsel %vm746_vm8, %v743_v36, %v745_v41 }
 0x1c8   : > { %v750_v37 = vsel %vm748_vm9, %v749_v45, %v747_v62 }
 0x1c9   : > { %v751_v50 = vadd.f32 1e-08, %v750_v37 }
 0x1cb   : > { %v753_v39 = vrot.slane %v751_v50, 1  ;;  %v754_v29 = vrot.slane %v751_v50, 2  ;;  %v755_v5 = vrot.slane %v751_v50, 3  ;;  %v756_v20 = vrot.slane %v751_v50, 4 }
 0x1cc   : > { %1050 = vrcp.f32 %v751_v50  ;;  %v757_v6 = vrot.slane %v751_v50, 5  ;;  %v758_v0 = vrot.slane %v751_v50, 6  ;;  %v759_v23 = vrot.slane %v751_v50, 7 }
 0x1cd   : > { %1052 = vrcp.f32 %v753_v39 }
 0x1ce   : > { %1054 = vrcp.f32 %v754_v29 }
 0x1cf   : > { %1056 = vrcp.f32 %v755_v5 }
 0x1d0   : > { %1058 = vrcp.f32 %v756_v20 }
 0x1d1   : > { %1060 = vrcp.f32 %v757_v6 }
 0x1d2   : > { %1062 = vrcp.f32 %v758_v0 }
 0x1d3   : > { %1064 = vrcp.f32 %v759_v23 }
 0x1d9   : > { %v1051_v33 = vpop.eup %1050 }
 0x1da   : > { %v1053_v13 = vpop.eup %1052  ;;  %v769_v1 = vmul.f32 %v1051_v33, %v1507_v17  ;;  %v770_v34 = vmul.f32 %v1051_v33, %v1513_v54 }
 0x1db   : > { %v1055_v32 = vpop.eup %1054  ;;  %v772_v35 = vmul.f32 %v1053_v13, %v1522_v49  ;;  %v773_v15 = vmul.f32 %v1053_v13, %v1524_v52 }
 0x1dc   : > { %v1057_v42 = vpop.eup %1056  ;;  %v775_v31 = vmul.f32 %v1055_v32, %v1526_v19  ;;  %v776_v3 = vmul.f32 %v1055_v32, %v1539_v44 }
 0x1dd   : > { %v1059_v16 = vpop.eup %1058  ;;  %v778_v43 = vmul.f32 %v1057_v42, %v1543_v46  ;;  %v779_v47 = vmul.f32 %v1057_v42, %v1545_v56  ;;  %v808_v22 = vrot.slane %v772_v35, 7  ;;  %v822_v57 = vrot.slane %v773_v15, 7 }
 0x1de   : > { %v1061_v58 = vpop.eup %1060  ;;  %v781_v49 = vmul.f32 %v1059_v16, %v1547_v60  ;;  %v782_v17 = vmul.f32 %v1059_v16, %v1551_v55  ;;  %v810_v54 = vrot.slane %v775_v31, 6  ;;  %v824_v52 = vrot.slane %v776_v3, 6 }
 0x1df   : > { %v1063_v19 = vpop.eup %1062  ;;  %v784_v44 = vmul.f32 %v1061_v58, %v1553_v4  ;;  %v785_v2 = vmul.f32 %v1061_v58, %v1559_v14  ;;  %v809_v46 = vsel %vm718_vm1, %v808_v22, %v769_v1  ;;  %v812_v56 = vrot.slane %v778_v43, 5 }
 0x1e0   : > { %v1065_v40 = vpop.eup %1064  ;;  %v787_v24 = vmul.f32 %v1063_v19, %v1567_v18  ;;  %v788_v25 = vmul.f32 %v1063_v19, %v1583_v30  ;;  %v811_v27 = vsel %vm720_vm2, %v810_v54, %v809_v46  ;;  %v814_v60 = vrot.slane %v781_v49, 4 }
 0x1e1   : > { %v790_v55 = vmul.f32 %v1065_v40, %v1590_v28  ;;  %v791_v61 = vmul.f32 %v1065_v40, %v1592_v38  ;;  %v813_v4 = vsel %vm722_vm3, %v812_v56, %v811_v27  ;;  %v816_v14 = vrot.slane %v784_v44, 3 }
 0x1e2   : > { %v815_v21 = vsel %vm724_vm4, %v814_v60, %v813_v4  ;;  %v818_v9 = vrot.slane %v787_v24, 2  ;;  %v823_v48 = vsel %vm718_vm1, %v822_v57, %v770_v34  ;;  %v826_v18 = vrot.slane %v779_v47, 5 }
 0x1e3   : > { %v817_v30 = vsel %vm726_vm5, %v816_v14, %v815_v21  ;;  %v820_v26 = vrot.slane %v790_v55, 1  ;;  %v825_v12 = vsel %vm720_vm2, %v824_v52, %v823_v48  ;;  %v828_v7 = vrot.slane %v782_v17, 4 }
 0x1e4   : > { %v819_v28 = vsel %vm728_vm6, %v818_v9, %v817_v30  ;;  %v827_v8 = vsel %vm722_vm3, %v826_v18, %v825_v12  ;;  %v830_v38 = vrot.slane %v785_v2, 3  ;;  %v832_v63 = vrot.slane %v788_v25, 2 }
 0x1e5   : > { %v821_v10 = vsel %vm730_vm7, %v820_v26, %v819_v28  ;;  %v829_v59 = vsel %vm724_vm4, %v828_v7, %v827_v8  ;;  %v834_v11 = vrot.slane %v791_v61, 1 }
 0x1e6   : > { %v831_v53 = vsel %vm726_vm5, %v830_v38, %v829_v59  ;;  %838 = vst [vmem:[%s167_s9] sm:$0xff] %v821_v10 }
 0x1e7   : > { %v833_v36 = vsel %vm728_vm6, %v832_v63, %v831_v53 }
 0x1e8   : > { %v835_v51 = vsel %vm730_vm7, %v834_v11, %v833_v36 }
 0x1e9   : > { %839 = vst [vmem:[%s167_s9 + $0x8] sm:$0xff] %v835_v51 }
 0x1ea   : > { %1079 = shalt.err (!%p1076_p3)
}
 0x1eb   : > { %s1080_s26 = scalar_lea.hbm %s1648_s13, 256  ;;  %s1084_s29 = scalar_lea.hbm %s1689_s3, 512 }
 0x1ec   : > { %p1081_p4 = scmp.ne.s32.totalorder %s1648_s13, %s1080_s26  ;;  %p1085_p9 = scmp.lt.s32.totalorder %s1648_s13, %s1689_s3 }
 0x1ed   : > { %p1086_p10 = scmp.lt.s32.totalorder %s1084_s29, %s1080_s26 }
 0x1ee   : > { %p1082_p7 = pnand %p1081_p4, %p1190_p5 }
 0x1ef   : > { %p1087_p11 = por %p1086_p10, %p1085_p9 }
 0x1f0   : > { %p1083_p8 = pneg %p1082_p7 }
 0x1f2   : > { %p1088_p12 = pnand %p1087_p11, %p1083_p8 }
 0x1f4   : > { %1091 = shalt.err (!%p1088_p12)
}
 0x1f5   : > { %929 = dma.vmem_to_hbm [thread:$0]  (%p1190_p5), %s856_s10, 256, %s1648_s13, %s841_s2  }
 0x1f6 PF: > { %p935_p13 = scmp.ge.s32.totalorder %s1126_s17, 2  ;;  %s867_s5 = sand.u32 1, %s1114_s14  }
 0x1f7   : > { %s868_s6 = scalar_lea.sflag [#allocation4], %s867_s5 }
 0x1f8   : > { %p932_p0 = pnand %p935_p13, %p1194_p6 }
 0x1fa   : > { %p933_p1 = pneg %p932_p0 }
 0x1fc   : > { %1109 = dma.done.wait (%p933_p1), %s868_s6, 256  }
 0x1fd   : > { %1111 = vsyncadd (%p933_p1), %s868_s6, 4294967040  ;;  %p14_p2 = scmp.ge.s32.totalorder %s1177_s19, 4   ;;  %s1710_s14 = smov %s1118_s15 }
 0x1fe   : > { %s1711_s15 = smov %s1122_s16  ;;  %s1712_s16 = smov %s1188_s22 }
 0x1ff   : > { %s1713_s17 = smov %s1177_s19  ;;  %16 = sbr.rel (!%p14_p2) target bundleno = 5 (0x5), region = 67 }
 0x204   :  { %873 = vsyncpa [#allocation4], 1 }
 0x205   :  { %875 = vsyncpa [#allocation4 + $0x1], 1 }

</bundles_post_ra>
